<compile_context>
chip_gen: v7x
topology: tpu7x:2x2x1
jax: 0.10.0
libtpu: 0.0.40
codegen_flags: <defaults>
</compile_context>

<pallas_src>
import functools

import jax
import jax.numpy as jnp
from jax import lax
from jax.experimental import pallas as pl
from jax.experimental.pallas import tpu as pltpu

LANES = 128  # lane padding for the conv-K (9*Cin) and the class dim


# ----------------------------- Pallas kernels ------------------------------ #

def _conv_relu_pool_kernel(p_ref, w_ref, b_ref, o_ref, cscr, hscr):
    # p_ref : (1, H*W, KP)     bf16 im2col patches for one image (lanes >= 9*Cin are 0)
    # w_ref : (KP, CP)         bf16 conv weight, rows (kh,kw,cin), zero padded
    # b_ref : (1, CP)          f32 conv bias, lanes padded to CP
    # o_ref : (1, Hp*Wp, Cout) f32 pooled activation, REAL channel count
    # cscr  : (H*W, CP)        f32 VMEM conv+relu scratch
    # hscr  : (H, Wp, CP)      f32 VMEM scratch after width-direction pool
    HW, CP = cscr.shape
    H, Wp, _ = hscr.shape
    Hp = H // 2
    Cout = o_ref.shape[2]

    # Conv as one MXU matmul (bf16 in, f32 accumulation), fused bias + ReLU.
    conv = jnp.dot(p_ref[0], w_ref[...], preferred_element_type=jnp.float32)
    cscr[...] = jnp.maximum(conv + b_ref[...], 0.0)           # (H*W, CP)

    # 2x2 max pool entirely in VMEM.  cscr rows are in (h, w) order, so the
    # w-direction reduction is a max over even/odd rows (strided reads)...
    wmax = jnp.maximum(cscr[pl.ds(0, H * Wp, 2), :],
                       cscr[pl.ds(1, H * Wp, 2), :])          # (H*Wp, CP) in (h, wp)
    hscr[...] = wmax.reshape(H, Wp, CP)
    # ... and the h-direction reduction is a max over even/odd major rows.
    pooled = jnp.maximum(hscr[pl.ds(0, Hp, 2), :, :],
                         hscr[pl.ds(1, Hp, 2), :, :])         # (Hp, Wp, CP)
    # Store only the real channels: padded lanes never leave the kernel.
    o_ref[0] = pooled.reshape(Hp * Wp, CP)[:, :Cout]


def _fc_kernel(x_ref, w_ref, b_ref, o_ref):
    # Classifier head: (TM, K) @ (K, CLS_PAD) + bias, lane-dense output.
    o_ref[...] = (jnp.dot(x_ref[...], w_ref[...],
                          preferred_element_type=jnp.float32) + b_ref[...])


# --------------------------- Host-side data prep ---------------------------- #

def _im2col(x_nhwc, k_pad):
    # Build the (N, H*W, k_pad) patch tensor in XLA (lane-aligned, bf16).
    N, H, W, Cin = x_nhwc.shape
    xp = jnp.pad(x_nhwc, ((0, 0), (1, 1), (1, 1), (0, 0)))
    cols = []
    for kh in range(3):
        for kw in range(3):
            cols.append(xp[:, kh:kh + H, kw:kw + W, :])
    p = jnp.concatenate(cols, axis=-1)                        # (N, H, W, 9*Cin)
    p = jnp.pad(p, ((0, 0), (0, 0), (0, 0), (0, k_pad - 9 * Cin)))
    return p.reshape(N, H * W, k_pad).astype(jnp.bfloat16)


def _prep_conv_weight(conv_w, conv_b, k_pad, c_pad):
    cout, cin, kh, kw = conv_w.shape
    w = jnp.transpose(conv_w, (2, 3, 1, 0)).reshape(kh * kw * cin, cout)
    w = jnp.pad(w, ((0, k_pad - kh * kw * cin), (0, c_pad - cout)))
    b = jnp.pad(conv_b, (0, c_pad - cout)).reshape(1, c_pad)
    return w.astype(jnp.bfloat16), b.astype(jnp.float32)


def _prep_fc_weight(fc_w, fc_b, cout, hp, wp, k_fc_pad, cls_pad):
    # fc_w rows follow PyTorch NCHW flatten order (c, hp, wp).  Permute rows to
    # (hp, wp, c) so the pooled NHWC activation feeds the FC with NO runtime
    # transpose; K stays at the REAL Hp*Wp*Cout (rounded up to 128 only once).
    num_classes = fc_w.shape[1]
    k_fc = hp * wp * cout
    w = fc_w.reshape(cout, hp, wp, num_classes)
    w = jnp.transpose(w, (1, 2, 0, 3)).reshape(k_fc, num_classes)
    w = jnp.pad(w, ((0, k_fc_pad - k_fc), (0, cls_pad - num_classes)))
    b = jnp.pad(fc_b, (0, cls_pad - num_classes)).reshape(1, cls_pad)
    return w.astype(jnp.bfloat16), b.astype(jnp.float32)


# --------------------------------- Forward ---------------------------------- #

def model_forward(x_nchw, params, num_classes):
    N, Cin, H, W = x_nchw.shape
    Cout = params["conv_w"].shape[0]
    assert H % 2 == 0 and W % 2 == 0
    Hp, Wp = H // 2, W // 2
    K_PAD = C_PAD = CLS_PAD = LANES
    assert 9 * Cin <= K_PAD and Cout <= C_PAD and num_classes <= CLS_PAD

    # Glue on the raw (small) input only: NCHW -> NHWC + im2col (lane-aligned).
    x_nhwc = jnp.transpose(x_nchw, (0, 2, 3, 1))
    patches = _im2col(x_nhwc, K_PAD)                          # (N, H*W, K_PAD) bf16

    wconv, bconv = _prep_conv_weight(params["conv_w"], params["conv_b"],
                                     K_PAD, C_PAD)

    pooled = pl.pallas_call(
        _conv_relu_pool_kernel,
        out_shape=jax.ShapeDtypeStruct((N, Hp * Wp, Cout), jnp.float32),
        grid=(N,),
        in_specs=[
            pl.BlockSpec((1, H * W, K_PAD), lambda n: (n, 0, 0)),
            pl.BlockSpec((K_PAD, C_PAD), lambda n: (0, 0)),   # VMEM-resident
            pl.BlockSpec((1, C_PAD), lambda n: (0, 0)),
        ],
        out_specs=pl.BlockSpec((1, Hp * Wp, Cout), lambda n: (n, 0, 0)),
        scratch_shapes=[
            pltpu.VMEM((H * W, C_PAD), jnp.float32),          # conv + relu
            pltpu.VMEM((H, Wp, C_PAD), jnp.float32),          # after w-pool
        ],
        compiler_params=pltpu.CompilerParams(
            dimension_semantics=("parallel",)),
    )(patches, wconv, bconv)

    # Contiguous (hp, wp, c) flatten -- real channel count, K = Hp*Wp*Cout.
    K_fc = Hp * Wp * Cout
    K_fc_pad = ((K_fc + LANES - 1) // LANES) * LANES
    xf = pooled.reshape(N, K_fc)
    xf = jnp.pad(xf, ((0, 0), (0, K_fc_pad - K_fc))).astype(jnp.bfloat16)

    wfc, bfc = _prep_fc_weight(params["fc_w"], params["fc_b"],
                               Cout, Hp, Wp, K_fc_pad, CLS_PAD)

    TM = min(N, 256)
    logits = pl.pallas_call(
        _fc_kernel,
        out_shape=jax.ShapeDtypeStruct((N, CLS_PAD), jnp.float32),
        grid=(pl.cdiv(N, TM),),
        in_specs=[
            pl.BlockSpec((TM, K_fc_pad), lambda i: (i, 0)),
            pl.BlockSpec((K_fc_pad, CLS_PAD), lambda i: (0, 0)),
            pl.BlockSpec((1, CLS_PAD), lambda i: (0, 0)),
        ],
        out_specs=pl.BlockSpec((TM, CLS_PAD), lambda i: (i, 0)),
        compiler_params=pltpu.CompilerParams(
            dimension_semantics=("parallel",)),
    )(xf, wfc, bfc)

    return logits[:, :num_classes]


# --------------------------- Pure-JAX reference ----------------------------- #

def reference_forward(x, params):
    # Matmul inputs quantized to bf16 exactly like the kernel path (f32 accum).
    xb = x.astype(jnp.bfloat16)
    cwb = params["conv_w"].astype(jnp.bfloat16)
    y = lax.conv_general_dilated(
        xb, cwb, window_strides=(1, 1), padding=((1, 1), (1, 1)),
        dimension_numbers=("NCHW", "OIHW", "NCHW"),
        preferred_element_type=jnp.float32)
    y = jnp.maximum(y + params["conv_b"].reshape(1, -1, 1, 1), 0.0)
    y = lax.reduce_window(y, -jnp.inf, lax.max,
                          window_dimensions=(1, 1, 2, 2),
                          window_strides=(1, 1, 2, 2), padding="VALID")
    flat = y.reshape(y.shape[0], -1).astype(jnp.bfloat16)
    fwb = params["fc_w"].astype(jnp.bfloat16)
    return (jnp.dot(flat, fwb, preferred_element_type=jnp.float32)
            + params["fc_b"])


# ---------------------------------- Main ------------------------------------ #

if __name__ == "__main__":
    N, Cin, H, W = 2, 4, 16, 16
    Cout, num_classes = 8, 10
    feat = Cout * (H // 2) * (W // 2)

    key = jax.random.PRNGKey(0)
    kx, kcw, kcb, kfw, kfb = jax.random.split(key, 5)
    x = jax.random.normal(kx, (N, Cin, H, W), dtype=jnp.float32)
    params = {
        "conv_w": 0.1 * jax.random.normal(kcw, (Cout, Cin, 3, 3), jnp.float32),
        "conv_b": 0.1 * jax.random.normal(kcb, (Cout,), jnp.float32),
        "fc_w":   0.05 * jax.random.normal(kfw, (feat, num_classes), jnp.float32),
        "fc_b":   0.05 * jax.random.normal(kfb, (num_classes,), jnp.float32),
    }

    forward = jax.jit(functools.partial(model_forward, num_classes=num_classes))
    out = jax.block_until_ready(forward(x, params))
    ref = jax.block_until_ready(reference_forward(x, params))

    assert out.shape == (N, num_classes), out.shape
    assert jnp.allclose(out, ref, atol=2e-3, rtol=2e-3), \
        float(jnp.max(jnp.abs(out - ref)))
    print("KERNEL_OK")
</pallas_src>

<mosaic_0001>
module attributes {stable_mosaic.version = 11 : i64} {
  func.func @_conv_relu_pool_kernel(%arg0: i32, %arg1: memref<1x256x128xbf16, #tpu.memory_space<vmem>>, %arg2: memref<128x128xbf16, #tpu.memory_space<vmem>>, %arg3: memref<1x128xf32, #tpu.memory_space<vmem>>, %arg4: memref<1x64x8xf32, #tpu.memory_space<vmem>>, %arg5: memref<256x128xf32, #tpu.memory_space<vmem>>, %arg6: memref<16x8x128xf32, #tpu.memory_space<vmem>>) attributes {dimension_semantics = [#tpu.dimension_semantics<parallel>], iteration_bounds = array<i64: 2>, scalar_prefetch = 0 : i64, scratch_operands = 2 : i64, tpu.core_type = #tpu.core_type<tc>, window_params = [{transform_indices = @transform_0, window_bounds = array<i64: 1, 256, 128>}, {pipeline_mode = #tpu.pipeline_mode<synchronous>, transform_indices = @transform_1, window_bounds = array<i64: 128, 128>}, {pipeline_mode = #tpu.pipeline_mode<synchronous>, transform_indices = @transform_2, window_bounds = array<i64: 1, 128>}, {transform_indices = @transform_3, window_bounds = array<i64: 1, 64, 8>}]} {
    %c0 = arith.constant 0 : index
    %c0_0 = arith.constant 0 : index
    %c0_1 = arith.constant 0 : index
    %0 = vector.load %arg1[%c0, %c0_0, %c0_1] : memref<1x256x128xbf16, #tpu.memory_space<vmem>>, vector<1x256x128xbf16>
    %1 = vector.shape_cast %0 : vector<1x256x128xbf16> to vector<256x128xbf16>
    %c0_2 = arith.constant 0 : index
    %c0_3 = arith.constant 0 : index
    %2 = vector.load %arg2[%c0_2, %c0_3] : memref<128x128xbf16, #tpu.memory_space<vmem>>, vector<128x128xbf16>
    %cst = arith.constant dense<0.000000e+00> : vector<256x128xf32>
    %3 = tpu.matmul %1, %2, %cst {dimension_numbers = #tpu.dot_dimension_numbers<[1], [0], [0], [1], [0, 0, 1, 1], [], []>} : vector<256x128xbf16>, vector<128x128xbf16>, vector<256x128xf32> -> vector<256x128xf32>
    %c0_4 = arith.constant 0 : index
    %c0_5 = arith.constant 0 : index
    %4 = vector.load %arg3[%c0_4, %c0_5] : memref<1x128xf32, #tpu.memory_space<vmem>>, vector<1x128xf32>
    %5 = vector.broadcast %4 : vector<1x128xf32> to vector<256x128xf32>
    %6 = arith.addf %3, %5 : vector<256x128xf32>
    %cst_6 = arith.constant 0.000000e+00 : f32
    %7 = vector.broadcast %cst_6 : f32 to vector<256x128xf32>
    %8 = arith.maximumf %6, %7 : vector<256x128xf32>
    %c0_7 = arith.constant 0 : index
    %c0_8 = arith.constant 0 : index
    %9 = vector.load %arg5[%c0_7, %c0_8] : memref<256x128xf32, #tpu.memory_space<vmem>>, vector<256x128xf32>
    tpu.vector_store %arg5[%c0_7, %c0_8], %8 {strides = array<i32>} : memref<256x128xf32, #tpu.memory_space<vmem>>, vector<256x128xf32>,
    %c0_9 = arith.constant 0 : index
    %c0_10 = arith.constant 0 : index
    %10 = tpu.strided_load %arg5[%c0_9, %c0_10] {strides = array<i32: 2, 1>} : memref<256x128xf32, #tpu.memory_space<vmem>>, vector<128x128xf32>
    %c1 = arith.constant 1 : index
    %c0_11 = arith.constant 0 : index
    %11 = tpu.strided_load %arg5[%c1, %c0_11] {strides = array<i32: 2, 1>} : memref<256x128xf32, #tpu.memory_space<vmem>>, vector<128x128xf32>
    %12 = arith.maximumf %10, %11 : vector<128x128xf32>
    %13 = vector.shape_cast %12 : vector<128x128xf32> to vector<16x8x128xf32>
    %c0_12 = arith.constant 0 : index
    %c0_13 = arith.constant 0 : index
    %c0_14 = arith.constant 0 : index
    %14 = vector.load %arg6[%c0_12, %c0_13, %c0_14] : memref<16x8x128xf32, #tpu.memory_space<vmem>>, vector<16x8x128xf32>
    tpu.vector_store %arg6[%c0_12, %c0_13, %c0_14], %13 {strides = array<i32>} : memref<16x8x128xf32, #tpu.memory_space<vmem>>, vector<16x8x128xf32>,
    %c0_15 = arith.constant 0 : index
    %c0_16 = arith.constant 0 : index
    %c0_17 = arith.constant 0 : index
    %15 = tpu.strided_load %arg6[%c0_15, %c0_16, %c0_17] {strides = array<i32: 2, 1, 1>} : memref<16x8x128xf32, #tpu.memory_space<vmem>>, vector<8x8x128xf32>
    %c1_18 = arith.constant 1 : index
    %c0_19 = arith.constant 0 : index
    %c0_20 = arith.constant 0 : index
    %16 = tpu.strided_load %arg6[%c1_18, %c0_19, %c0_20] {strides = array<i32: 2, 1, 1>} : memref<16x8x128xf32, #tpu.memory_space<vmem>>, vector<8x8x128xf32>
    %17 = arith.maximumf %15, %16 : vector<8x8x128xf32>
    %18 = vector.shape_cast %17 : vector<8x8x128xf32> to vector<64x128xf32>
    %19 = vector.extract_strided_slice %18 {offsets = [0, 0], sizes = [64, 8], strides = [1, 1]} : vector<64x128xf32> to vector<64x8xf32>
    %c0_21 = arith.constant 0 : index
    %c0_22 = arith.constant 0 : index
    %c0_23 = arith.constant 0 : index
    %20 = vector.load %arg4[%c0_21, %c0_22, %c0_23] : memref<1x64x8xf32, #tpu.memory_space<vmem>>, vector<1x64x8xf32>
    %21 = vector.shape_cast %20 : vector<1x64x8xf32> to vector<64x8xf32>
    %22 = vector.shape_cast %19 : vector<64x8xf32> to vector<1x64x8xf32>
    tpu.vector_store %arg4[%c0_21, %c0_22, %c0_23], %22 {strides = array<i32>} : memref<1x64x8xf32, #tpu.memory_space<vmem>>, vector<1x64x8xf32>,
    return
  }
  func.func @transform_0(%arg0: i32) -> (i32, i32, i32) {
    %c0_i32 = arith.constant 0 : i32
    %c0_i32_0 = arith.constant 0 : i32
    %c0_i32_1 = arith.constant 0 : i32
    return %arg0, %c0_i32, %c0_i32_0 : i32, i32, i32
  }
  func.func @transform_1(%arg0: i32) -> (i32, i32) {
    %c0_i32 = arith.constant 0 : i32
    %c0_i32_0 = arith.constant 0 : i32
    %c0_i32_1 = arith.constant 0 : i32
    return %c0_i32, %c0_i32_0 : i32, i32
  }
  func.func @transform_2(%arg0: i32) -> (i32, i32) {
    %c0_i32 = arith.constant 0 : i32
    %c0_i32_0 = arith.constant 0 : i32
    %c0_i32_1 = arith.constant 0 : i32
    return %c0_i32, %c0_i32_0 : i32, i32
  }
  func.func @transform_3(%arg0: i32) -> (i32, i32, i32) {
    %c0_i32 = arith.constant 0 : i32
    %c0_i32_0 = arith.constant 0 : i32
    %c0_i32_1 = arith.constant 0 : i32
    return %arg0, %c0_i32, %c0_i32_0 : i32, i32, i32
  }
}

module attributes {stable_mosaic.version = 11 : i64} {
  func.func @_fc_kernel(%arg0: i32, %arg1: memref<2x512xbf16, #tpu.memory_space<vmem>>, %arg2: memref<512x128xbf16, #tpu.memory_space<vmem>>, %arg3: memref<1x128xf32, #tpu.memory_space<vmem>>, %arg4: memref<2x128xf32, #tpu.memory_space<vmem>>) attributes {dimension_semantics = [#tpu.dimension_semantics<parallel>], iteration_bounds = array<i64: 1>, scalar_prefetch = 0 : i64, scratch_operands = 0 : i64, tpu.core_type = #tpu.core_type<tc>, window_params = [{transform_indices = @transform_0, window_bounds = array<i64: 2, 512>}, {pipeline_mode = #tpu.pipeline_mode<synchronous>, transform_indices = @transform_1, window_bounds = array<i64: 512, 128>}, {pipeline_mode = #tpu.pipeline_mode<synchronous>, transform_indices = @transform_2, window_bounds = array<i64: 1, 128>}, {transform_indices = @transform_3, window_bounds = array<i64: 2, 128>}]} {
    %c0 = arith.constant 0 : index
    %c0_0 = arith.constant 0 : index
    %0 = vector.load %arg1[%c0, %c0_0] : memref<2x512xbf16, #tpu.memory_space<vmem>>, vector<2x512xbf16>
    %c0_1 = arith.constant 0 : index
    %c0_2 = arith.constant 0 : index
    %1 = vector.load %arg2[%c0_1, %c0_2] : memref<512x128xbf16, #tpu.memory_space<vmem>>, vector<512x128xbf16>
    %cst = arith.constant dense<0.000000e+00> : vector<2x128xf32>
    %2 = tpu.matmul %0, %1, %cst {dimension_numbers = #tpu.dot_dimension_numbers<[1], [0], [0], [1], [0, 0, 1, 1], [], []>} : vector<2x512xbf16>, vector<512x128xbf16>, vector<2x128xf32> -> vector<2x128xf32>
    %c0_3 = arith.constant 0 : index
    %c0_4 = arith.constant 0 : index
    %3 = vector.load %arg3[%c0_3, %c0_4] : memref<1x128xf32, #tpu.memory_space<vmem>>, vector<1x128xf32>
    %4 = vector.broadcast %3 : vector<1x128xf32> to vector<2x128xf32>
    %5 = arith.addf %2, %4 : vector<2x128xf32>
    %c0_5 = arith.constant 0 : index
    %c0_6 = arith.constant 0 : index
    %6 = vector.load %arg4[%c0_5, %c0_6] : memref<2x128xf32, #tpu.memory_space<vmem>>, vector<2x128xf32>
    tpu.vector_store %arg4[%c0_5, %c0_6], %5 {strides = array<i32>} : memref<2x128xf32, #tpu.memory_space<vmem>>, vector<2x128xf32>,
    return
  }
  func.func @transform_0(%arg0: i32) -> (i32, i32) {
    %c0_i32 = arith.constant 0 : i32
    %c0_i32_0 = arith.constant 0 : i32
    return %arg0, %c0_i32 : i32, i32
  }
  func.func @transform_1(%arg0: i32) -> (i32, i32) {
    %c0_i32 = arith.constant 0 : i32
    %c0_i32_0 = arith.constant 0 : i32
    %c0_i32_1 = arith.constant 0 : i32
    return %c0_i32, %c0_i32_0 : i32, i32
  }
  func.func @transform_2(%arg0: i32) -> (i32, i32) {
    %c0_i32 = arith.constant 0 : i32
    %c0_i32_0 = arith.constant 0 : i32
    %c0_i32_1 = arith.constant 0 : i32
    return %c0_i32, %c0_i32_0 : i32, i32
  }
  func.func @transform_3(%arg0: i32) -> (i32, i32) {
    %c0_i32 = arith.constant 0 : i32
    %c0_i32_0 = arith.constant 0 : i32
    return %arg0, %c0_i32 : i32, i32
  }
}

</mosaic_0001>

<bundles_post_ra>
// kernel: model_forward.2
= control target key start
LH: loop header
LB: loop body
LE: loop exit
PB: predicated region body
PF: predicated region fallthrough
CT: control target
= control target key end

     0   :  { %s966_s12 = smov 0   ;;  %s1084_s0 = inlined_call_operand.vmem [shape: bf16[2,256,128], index: 0, kind: input, shape index: {}]   ;;  %s1085_s1 = inlined_call_operand.vmem [shape: bf16[128,128], index: 1, kind: input, shape index: {}]   ;;  %s1086_s2 = inlined_call_operand.vmem [shape: f32[1,128], index: 2, kind: input, shape index: {}]   ;;  %s1087_s3 = inlined_call_operand.vmem [shape: f32[2,64,8], index: 3, kind: output, shape index: {}]  }
   0x1 LB: > { %s780_s13 = sadd.s32 4294967295, %s944_s12   ;;  %p784_p0 = scmp.ge.s32.totalorder %s944_s12, 1  ;;  %s944_s12 = sphi %s966_s12, %s13_s12  }
   0x2   : > { %p137_p1 = scmp.lt.s32.totalorder %s944_s12, 3 }
   0x4   : > { %p138_p2 = pnand %p784_p0, %p137_p1 }
   0x5   : > { %v914_v0 = vld [vmem:[%s1085_s1] sm:$0xff] (!%p138_p2)   ;;  %p161_p3 = scmp.lt.s32.totalorder (!%p138_p2), %s780_s13, 1  ;;  %v915_v1 = vld [vmem:[%s1085_s1 + $0x8] sm:$0xff] (!%p138_p2)   ;;  %v916_v2 = vld [vmem:[%s1085_s1 + $0x10] sm:$0xff] (!%p138_p2)   ;;  %vm716_vm0 = vcmask (!%p138_p2), 64512  }
   0x6   : > { %141 = sbr.rel (%p138_p2) target bundleno = 299 (0x12b), region = 32  ;;  %842 = vmatprep.subr.bf16.mxu0 (!%p138_p2), %v914_v0  ;;  %890 = vmatprep.subr.bf16.mxu1 (!%p138_p2), %v914_v0  ;;  %v917_v3 = vld [vmem:[%s1085_s1 + $0x18] sm:$0xff] (!%p138_p2)   ;;  %v918_v6 = vld [vmem:[%s1085_s1 + $0x20] sm:$0xff] (!%p138_p2)   ;;  %v919_v7 = vld [vmem:[%s1085_s1 + $0x28] sm:$0xff] (!%p138_p2)  }
   0x7   : > { %843 = vmatpush3.bf16.msra.mxu0 (!%p138_p2), %v914_v0  ;;  %898 = vmatpush3.bf16.msra.mxu1 (!%p138_p2), %v914_v0  ;;  %v920_v8 = vld [vmem:[%s1085_s1 + $0x30] sm:$0xff] (!%p138_p2)   ;;  %v921_v9 = vld [vmem:[%s1085_s1 + $0x38] sm:$0xff] (!%p138_p2)   ;;  %v1025_v24 = vld [vmem:[%s1086_s2] ss:$0 sm:$0xff] (!%p138_p2) }
   0x8   : > { %844 = vmatprep.subr.bf16.mxu0 (!%p138_p2), %v915_v1  ;;  %891 = vmatprep.subr.bf16.mxu1 (!%p138_p2), %v915_v1 }
   0xb   : > { %845 = vmatpush3.bf16.msra.mxu0 (!%p138_p2), %v915_v1  ;;  %899 = vmatpush3.bf16.msra.mxu1 (!%p138_p2), %v915_v1 }
   0xc   : > { %846 = vmatprep.subr.bf16.mxu0 (!%p138_p2), %v916_v2  ;;  %892 = vmatprep.subr.bf16.mxu1 (!%p138_p2), %v916_v2 }
   0xd   : > { %s1089_s13 = smov (!%p161_p3, %s780_s13), 1 }
   0xe   : > { %s816_s20 = sshll.u32 %s1089_s13, 7  ;;  %s817_s9 = sshll.u32 %s1089_s13, 6 }
   0xf   : > { %s989_s23 = scalar_lea.vmem %s1084_s0, %s816_s20  ;;  %847 = vmatpush3.bf16.msra.mxu0 %v916_v2  ;;  %900 = vmatpush3.bf16.msra.mxu1 %v916_v2  ;;  %s1047_s13 = scalar_lea.vmem %s1087_s3, %s817_s9 }
  0x10   : > { %v922_v4 = vld [vmem:[%s989_s23] sm:$0xff]   ;;  %848 = vmatprep.subr.bf16.mxu0 %v917_v3  ;;  %893 = vmatprep.subr.bf16.mxu1 %v917_v3  ;;  %v924_v10 = vld [vmem:[%s989_s23 + $0x8] sm:$0xff]   ;;  %v926_v12 = vld [vmem:[%s989_s23 + $0x10] sm:$0xff]  }
  0x11   : > { %v923_v5 = vld [vmem:[%s989_s23 + $0x40] sm:$0xff]   ;;  %858 = vmatprep.mubr.bf16.mxu0 %v922_v4  ;;  %v925_v11 = vld [vmem:[%s989_s23 + $0x48] sm:$0xff]   ;;  %v927_v13 = vld [vmem:[%s989_s23 + $0x50] sm:$0xff]  }
  0x12   : > { %874 = vmatprep.mubr.bf16.mxu1 %v923_v5  ;;  %v928_v14 = vld [vmem:[%s989_s23 + $0x18] sm:$0xff]   ;;  %v930_v16 = vld [vmem:[%s989_s23 + $0x20] sm:$0xff]   ;;  %v932_v18 = vld [vmem:[%s989_s23 + $0x28] sm:$0xff]  }
  0x13   : > { %849 = vmatpush3.bf16.msra.mxu0 %v917_v3  ;;  %901 = vmatpush3.bf16.msra.mxu1 %v917_v3  ;;  %v929_v15 = vld [vmem:[%s989_s23 + $0x58] sm:$0xff]   ;;  %v931_v17 = vld [vmem:[%s989_s23 + $0x60] sm:$0xff]   ;;  %v933_v19 = vld [vmem:[%s989_s23 + $0x68] sm:$0xff]  }
  0x14   : > { %850 = vmatprep.subr.bf16.mxu0 %v918_v6  ;;  %894 = vmatprep.subr.bf16.mxu1 %v918_v6  ;;  %v934_v20 = vld [vmem:[%s989_s23 + $0x30] sm:$0xff]   ;;  %v936_v22 = vld [vmem:[%s989_s23 + $0x38] sm:$0xff]  }
  0x15   : > { %v935_v21 = vld [vmem:[%s989_s23 + $0x70] sm:$0xff]   ;;  %v937_v23 = vld [vmem:[%s989_s23 + $0x78] sm:$0xff]  }
  0x17   : > { %851 = vmatpush3.bf16.msra.mxu0 %v918_v6  ;;  %902 = vmatpush3.bf16.msra.mxu1 %v918_v6 }
  0x18   : > { %852 = vmatprep.subr.bf16.mxu0 %v919_v7  ;;  %895 = vmatprep.subr.bf16.mxu1 %v919_v7 }
  0x1b   : > { %853 = vmatpush3.bf16.msra.mxu0 %v919_v7  ;;  %903 = vmatpush3.bf16.msra.mxu1 %v919_v7 }
  0x1c   : > { %854 = vmatprep.subr.bf16.mxu0 %v920_v8  ;;  %896 = vmatprep.subr.bf16.mxu1 %v920_v8 }
  0x1f   : > { %855 = vmatpush3.bf16.msra.mxu0 %v920_v8  ;;  %904 = vmatpush3.bf16.msra.mxu1 %v920_v8 }
  0x20   : > { %856 = vmatprep.subr.bf16.mxu0 %v921_v9  ;;  %897 = vmatprep.subr.bf16.mxu1 %v921_v9 }
  0x23   : > { %857 = vmatpush3.bf16.msra.mxu0 %v921_v9  ;;  %905 = vmatpush3.bf16.msra.mxu1 %v921_v9 }
  0x26   : > { %859 = vmatmul.mubr.bf16.vlgmr.msra.gmra.mrb[0].mxu0 %v924_v10  ;;  %875 = vmatmul.mubr.bf16.vlgmr.msra.gmra.mrb[0].mxu1 %v925_v11 }
  0x27   : > { %862 = vmatprep.mubr.bf16.mxu0 %v926_v12  ;;  %878 = vmatprep.mubr.bf16.mxu1 %v927_v13 }
  0x2e   : > { %863 = vmatmul.mubr.bf16.gmra.mrb[4].mxu0 %v928_v14  ;;  %879 = vmatmul.mubr.bf16.gmra.mrb[4].mxu1 %v929_v15 }
  0x2f   : > { %866 = vmatprep.mubr.bf16.mxu0 %v930_v16  ;;  %882 = vmatprep.mubr.bf16.mxu1 %v931_v17 }
  0x36   : > { %867 = vmatmul.mubr.bf16.gmra.mrb[8].mxu0 %v932_v18  ;;  %883 = vmatmul.mubr.bf16.gmra.mrb[8].mxu1 %v933_v19 }
  0x37   : > { %870 = vmatprep.mubr.bf16.mxu0 %v934_v20  ;;  %886 = vmatprep.mubr.bf16.mxu1 %v935_v21 }
  0x3e   : > { %871 = vmatmul.mubr.bf16.gmra.mrb[12].mxu0 %v936_v22  ;;  %887 = vmatmul.mubr.bf16.gmra.mrb[12].mxu1 %v937_v23 }
  0xf9   : > { %v860_v25 = vpop.f32.mrb[0].mxu0  ;;  %v876_v26 = vpop.f32.mrb[0].mxu1 }
  0xfa   : > { %v414_v27 = vadd.f32 %v860_v25, %v1025_v24  ;;  %v478_v28 = vadd.f32 %v876_v26, %v1025_v24  ;;  %v405_v29 = vpop.f32.mrb[1].mxu0  ;;  %v469_v30 = vpop.f32.mrb[1].mxu1 }
  0xfb   : > { %v406_v31 = vadd.f32 %v1025_v24, %v405_v29  ;;  %v470_v32 = vadd.f32 %v1025_v24, %v469_v30  ;;  %v861_v33 = vpop.f32.mrb[2].mxu0  ;;  %v877_v34 = vpop.f32.mrb[2].mxu1 }
  0xfc   : > { %v534_v35 = vmax.f32 %v414_v27, 0.0  ;;  %v550_v36 = vmax.f32 %v478_v28, 0.0  ;;  %v417_v37 = vadd.f32 %v861_v33, %v1025_v24  ;;  %v481_v38 = vadd.f32 %v877_v34, %v1025_v24  ;;  %v408_v39 = vpop.f32.mrb[3].mxu0  ;;  %v472_v40 = vpop.f32.mrb[3].mxu1 }
  0xfd   : > { %v532_v41 = vmax.f32 %v406_v31, 0.0  ;;  %v548_v42 = vmax.f32 %v470_v32, 0.0  ;;  %v409_v43 = vadd.f32 %v1025_v24, %v408_v39  ;;  %v473_v44 = vadd.f32 %v1025_v24, %v472_v40 }
  0xfe   : > { %566 = vst [vmem:[#allocation2 + $0x10] sm:$0xff] %v534_v35  ;;  %582 = vst [vmem:[#allocation2 + $0x90] sm:$0xff] %v550_v36  ;;  %v535_v45 = vmax.f32 %v417_v37, 0.0  ;;  %v551_v46 = vmax.f32 %v481_v38, 0.0 }
  0xff   : > { %564 = vst [vmem:[#allocation2] sm:$0xff] %v532_v41  ;;  %580 = vst [vmem:[#allocation2 + $0x80] sm:$0xff] %v548_v42  ;;  %v533_v47 = vmax.f32 %v409_v43, 0.0  ;;  %v549_v48 = vmax.f32 %v473_v44, 0.0 }
 0x100   : > { %567 = vst [vmem:[#allocation2 + $0x18] sm:$0xff] %v535_v45  ;;  %583 = vst [vmem:[#allocation2 + $0x98] sm:$0xff] %v551_v46 }
 0x101   : > { %565 = vst [vmem:[#allocation2 + $0x8] sm:$0xff] %v533_v47  ;;  %581 = vst [vmem:[#allocation2 + $0x88] sm:$0xff] %v549_v48  ;;  %v864_v49 = vpop.f32.mrb[4].mxu0  ;;  %v880_v50 = vpop.f32.mrb[4].mxu1 }
 0x102   : > { %v430_v51 = vadd.f32 %v864_v49, %v1025_v24  ;;  %v494_v52 = vadd.f32 %v880_v50, %v1025_v24  ;;  %v421_v53 = vpop.f32.mrb[5].mxu0  ;;  %v485_v54 = vpop.f32.mrb[5].mxu1 }
 0x103   : > { %v422_v55 = vadd.f32 %v1025_v24, %v421_v53  ;;  %v486_v56 = vadd.f32 %v1025_v24, %v485_v54  ;;  %v865_v57 = vpop.f32.mrb[6].mxu0  ;;  %v881_v58 = vpop.f32.mrb[6].mxu1 }
 0x104   : > { %v538_v59 = vmax.f32 %v430_v51, 0.0  ;;  %v554_v60 = vmax.f32 %v494_v52, 0.0  ;;  %v433_v61 = vadd.f32 %v865_v57, %v1025_v24  ;;  %v497_v62 = vadd.f32 %v881_v58, %v1025_v24  ;;  %v424_v63 = vpop.f32.mrb[7].mxu0  ;;  %v488_v0 = vpop.f32.mrb[7].mxu1 }
 0x105   : > { %v536_v1 = vmax.f32 %v422_v55, 0.0  ;;  %v552_v2 = vmax.f32 %v486_v56, 0.0  ;;  %v425_v3 = vadd.f32 %v1025_v24, %v424_v63  ;;  %v489_v4 = vadd.f32 %v1025_v24, %v488_v0 }
 0x106   : > { %570 = vst [vmem:[#allocation2 + $0x30] sm:$0xff] %v538_v59  ;;  %586 = vst [vmem:[#allocation2 + $0xb0] sm:$0xff] %v554_v60  ;;  %v539_v5 = vmax.f32 %v433_v61, 0.0  ;;  %v555_v6 = vmax.f32 %v497_v62, 0.0 }
 0x107   : > { %v598_v7 = vld [vmem:[#allocation2 + $0x10] ss:$2 sm:$0xff]  ;;  %v630_v8 = vld [vmem:[#allocation2 + $0x11] ss:$2 sm:$0xff]  ;;  %568 = vst [vmem:[#allocation2 + $0x20] sm:$0xff] %v536_v1  ;;  %584 = vst [vmem:[#allocation2 + $0xa0] sm:$0xff] %v552_v2 }
 0x108   : > { %v614_v9 = vld [vmem:[#allocation2 + $0x90] ss:$2 sm:$0xff]  ;;  %v660_v10 = vmax.f32 %v598_v7, %v630_v8  ;;  %v646_v11 = vld [vmem:[#allocation2 + $0x91] ss:$2 sm:$0xff]  ;;  %v596_v12 = vld [vmem:[#allocation2] ss:$2 sm:$0xff] }
 0x109   : > { %v628_v13 = vld [vmem:[#allocation2 + $0x1] ss:$2 sm:$0xff]  ;;  %571 = vst [vmem:[#allocation2 + $0x38] sm:$0xff] %v539_v5  ;;  %587 = vst [vmem:[#allocation2 + $0xb8] sm:$0xff] %v555_v6  ;;  %v668_v14 = vmax.f32 %v614_v9, %v646_v11  ;;  %v612_v16 = vld [vmem:[#allocation2 + $0x80] ss:$2 sm:$0xff] }
 0x10a   : > { %v659_v15 = vmax.f32 %v596_v12, %v628_v13  ;;  %v644_v17 = vld [vmem:[#allocation2 + $0x81] ss:$2 sm:$0xff]  ;;  %v537_v18 = vmax.f32 %v425_v3, 0.0  ;;  %v553_v19 = vmax.f32 %v489_v4, 0.0  ;;  %v868_v21 = vpop.f32.mrb[8].mxu0  ;;  %v884_v22 = vpop.f32.mrb[8].mxu1 }
 0x10b   : > { %v667_v20 = vmax.f32 %v612_v16, %v644_v17  ;;  %v446_v25 = vadd.f32 %v868_v21, %v1025_v24  ;;  %v510_v26 = vadd.f32 %v884_v22, %v1025_v24  ;;  %v437_v27 = vpop.f32.mrb[9].mxu0  ;;  %v501_v28 = vpop.f32.mrb[9].mxu1 }
 0x10c   : > { %v708_v23 = vmax.f32 %v659_v15, %v660_v10  ;;  %569 = vst [vmem:[#allocation2 + $0x28] sm:$0xff] %v537_v18  ;;  %585 = vst [vmem:[#allocation2 + $0xa8] sm:$0xff] %v553_v19  ;;  %v438_v30 = vadd.f32 %v1025_v24, %v437_v27  ;;  %v502_v31 = vadd.f32 %v1025_v24, %v501_v28  ;;  %v869_v32 = vpop.f32.mrb[10].mxu0  ;;  %v885_v33 = vpop.f32.mrb[10].mxu1 }
 0x10d   : > { %v712_v29 = vmax.f32 %v667_v20, %v668_v14  ;;  %v542_v34 = vmax.f32 %v446_v25, 0.0  ;;  %v558_v35 = vmax.f32 %v510_v26, 0.0  ;;  %v449_v36 = vadd.f32 %v869_v32, %v1025_v24  ;;  %v440_v38 = vpop.f32.mrb[11].mxu0  ;;  %v504_v39 = vpop.f32.mrb[11].mxu1 }
 0x10e   : > { %717 = vst.msk [vmem:[%s1047_s13] sm:$0xff] %vm716_vm0, %v708_v23  ;;  %v513_v37 = vadd.f32 %v885_v33, %v1025_v24  ;;  %v540_v40 = vmax.f32 %v438_v30, 0.0  ;;  %v556_v41 = vmax.f32 %v502_v31, 0.0  ;;  %v441_v42 = vadd.f32 %v1025_v24, %v440_v38 }
 0x10f   : > { %721 = vst.msk [vmem:[%s1047_s13 + $0x20] sm:$0xff] %vm716_vm0, %v712_v29  ;;  %v505_v43 = vadd.f32 %v1025_v24, %v504_v39  ;;  %574 = vst [vmem:[#allocation2 + $0x50] sm:$0xff] %v542_v34  ;;  %v543_v48 = vmax.f32 %v449_v36, 0.0 }
 0x110   : > { %v602_v44 = vld [vmem:[#allocation2 + $0x30] ss:$2 sm:$0xff]  ;;  %v634_v45 = vld [vmem:[#allocation2 + $0x31] ss:$2 sm:$0xff]  ;;  %590 = vst [vmem:[#allocation2 + $0xd0] sm:$0xff] %v558_v35  ;;  %572 = vst [vmem:[#allocation2 + $0x40] sm:$0xff] %v540_v40 }
 0x111   : > { %v618_v46 = vld [vmem:[#allocation2 + $0xb0] ss:$2 sm:$0xff]  ;;  %v650_v47 = vld [vmem:[#allocation2 + $0xb1] ss:$2 sm:$0xff]  ;;  %588 = vst [vmem:[#allocation2 + $0xc0] sm:$0xff] %v556_v41  ;;  %v559_v49 = vmax.f32 %v513_v37, 0.0  ;;  %v662_v51 = vmax.f32 %v602_v44, %v634_v45 }
 0x112   : > { %v541_v50 = vmax.f32 %v441_v42, 0.0  ;;  %v557_v52 = vmax.f32 %v505_v43, 0.0  ;;  %v872_v53 = vpop.f32.mrb[12].mxu0  ;;  %v888_v54 = vpop.f32.mrb[12].mxu1  ;;  %v670_v55 = vmax.f32 %v618_v46, %v650_v47  ;;  %575 = vst [vmem:[#allocation2 + $0x58] sm:$0xff] %v543_v48 }
 0x113   : > { %v600_v56 = vld [vmem:[#allocation2 + $0x20] ss:$2 sm:$0xff]  ;;  %v632_v57 = vld [vmem:[#allocation2 + $0x21] ss:$2 sm:$0xff]  ;;  %591 = vst [vmem:[#allocation2 + $0xd8] sm:$0xff] %v559_v49  ;;  %v462_v59 = vadd.f32 %v872_v53, %v1025_v24  ;;  %v526_v60 = vadd.f32 %v888_v54, %v1025_v24  ;;  %v453_v63 = vpop.f32.mrb[13].mxu0 }
 0x114   : > { %v616_v58 = vld [vmem:[#allocation2 + $0xa0] ss:$2 sm:$0xff]  ;;  %573 = vst [vmem:[#allocation2 + $0x48] sm:$0xff] %v541_v50  ;;  %v661_v61 = vmax.f32 %v600_v56, %v632_v57  ;;  %v648_v62 = vld [vmem:[#allocation2 + $0xa1] ss:$2 sm:$0xff]  ;;  %589 = vst [vmem:[#allocation2 + $0xc8] sm:$0xff] %v557_v52  ;;  %v454_v4 = vadd.f32 %v1025_v24, %v453_v63 }
 0x115   : > { %v517_v0 = vpop.f32.mrb[13].mxu1  ;;  %v669_v1 = vmax.f32 %v616_v58, %v648_v62  ;;  %v546_v2 = vmax.f32 %v462_v59, 0.0  ;;  %v562_v3 = vmax.f32 %v526_v60, 0.0  ;;  %v873_v5 = vpop.f32.mrb[14].mxu0 }
 0x116   : > { %v889_v6 = vpop.f32.mrb[14].mxu1  ;;  %v709_v7 = vmax.f32 %v661_v61, %v662_v51  ;;  %v518_v8 = vadd.f32 %v1025_v24, %v517_v0  ;;  %v465_v9 = vadd.f32 %v873_v5, %v1025_v24  ;;  %v456_v11 = vpop.f32.mrb[15].mxu0  ;;  %v544_v14 = vmax.f32 %v454_v4, 0.0 }
 0x117   : > { %v529_v10 = vadd.f32 %v889_v6, %v1025_v24  ;;  %v520_v12 = vpop.f32.mrb[15].mxu1  ;;  %v713_v13 = vmax.f32 %v669_v1, %v670_v55  ;;  %578 = vst [vmem:[#allocation2 + $0x70] sm:$0xff] %v546_v2  ;;  %594 = vst [vmem:[#allocation2 + $0xf0] sm:$0xff] %v562_v3  ;;  %v457_v15 = vadd.f32 %v1025_v24, %v456_v11 }
 0x118   : > { %v521_v16 = vadd.f32 %v1025_v24, %v520_v12  ;;  %718 = vst.msk [vmem:[%s1047_s13 + $0x8] sm:$0xff] %vm716_vm0, %v709_v7  ;;  %v560_v17 = vmax.f32 %v518_v8, 0.0  ;;  %v547_v18 = vmax.f32 %v465_v9, 0.0  ;;  %576 = vst [vmem:[#allocation2 + $0x60] sm:$0xff] %v544_v14 }
 0x119   : > { %v563_v19 = vmax.f32 %v529_v10, 0.0  ;;  %722 = vst.msk [vmem:[%s1047_s13 + $0x28] sm:$0xff] %vm716_vm0, %v713_v13  ;;  %v545_v20 = vmax.f32 %v457_v15, 0.0  ;;  %v606_v22 = vld [vmem:[#allocation2 + $0x50] ss:$2 sm:$0xff] }
 0x11a   : > { %v561_v21 = vmax.f32 %v521_v16, 0.0  ;;  %v638_v23 = vld [vmem:[#allocation2 + $0x51] ss:$2 sm:$0xff]  ;;  %v622_v25 = vld [vmem:[#allocation2 + $0xd0] ss:$2 sm:$0xff]  ;;  %592 = vst [vmem:[#allocation2 + $0xe0] sm:$0xff] %v560_v17 }
 0x11b   : > { %579 = vst [vmem:[#allocation2 + $0x78] sm:$0xff] %v547_v18  ;;  %595 = vst [vmem:[#allocation2 + $0xf8] sm:$0xff] %v563_v19  ;;  %v664_v26 = vmax.f32 %v606_v22, %v638_v23  ;;  %v654_v24 = vld [vmem:[#allocation2 + $0xd1] ss:$2 sm:$0xff]  ;;  %v604_v27 = vld [vmem:[#allocation2 + $0x40] ss:$2 sm:$0xff] }
 0x11c   : > { %v636_v28 = vld [vmem:[#allocation2 + $0x41] ss:$2 sm:$0xff]  ;;  %577 = vst [vmem:[#allocation2 + $0x68] sm:$0xff] %v545_v20  ;;  %593 = vst [vmem:[#allocation2 + $0xe8] sm:$0xff] %v561_v21  ;;  %v672_v29 = vmax.f32 %v622_v25, %v654_v24  ;;  %v620_v31 = vld [vmem:[#allocation2 + $0xc0] ss:$2 sm:$0xff] }
 0x11d   : > { %v663_v30 = vmax.f32 %v604_v27, %v636_v28  ;;  %v652_v32 = vld [vmem:[#allocation2 + $0xc1] ss:$2 sm:$0xff] }
 0x11e   : > { %v671_v33 = vmax.f32 %v620_v31, %v652_v32 }
 0x11f   : > { %v710_v34 = vmax.f32 %v663_v30, %v664_v26 }
 0x120   : > { %v714_v35 = vmax.f32 %v671_v33, %v672_v29 }
 0x121   : > { %719 = vst.msk [vmem:[%s1047_s13 + $0x10] sm:$0xff] %vm716_vm0, %v710_v34 }
 0x122   : > { %723 = vst.msk [vmem:[%s1047_s13 + $0x30] sm:$0xff] %vm716_vm0, %v714_v35  ;;  %v610_v36 = vld [vmem:[#allocation2 + $0x70] ss:$2 sm:$0xff]  ;;  %v642_v37 = vld [vmem:[#allocation2 + $0x71] ss:$2 sm:$0xff] }
 0x123   : > { %v626_v38 = vld [vmem:[#allocation2 + $0xf0] ss:$2 sm:$0xff]  ;;  %v666_v39 = vmax.f32 %v610_v36, %v642_v37  ;;  %v658_v40 = vld [vmem:[#allocation2 + $0xf1] ss:$2 sm:$0xff]  ;;  %v608_v41 = vld [vmem:[#allocation2 + $0x60] ss:$2 sm:$0xff] }
 0x124   : > { %v640_v42 = vld [vmem:[#allocation2 + $0x61] ss:$2 sm:$0xff]  ;;  %v674_v43 = vmax.f32 %v626_v38, %v658_v40  ;;  %v624_v45 = vld [vmem:[#allocation2 + $0xe0] ss:$2 sm:$0xff] }
 0x125   : > { %v665_v44 = vmax.f32 %v608_v41, %v640_v42  ;;  %v656_v46 = vld [vmem:[#allocation2 + $0xe1] ss:$2 sm:$0xff] }
 0x126   : > { %v673_v47 = vmax.f32 %v624_v45, %v656_v46 }
 0x127   : > { %v711_v48 = vmax.f32 %v665_v44, %v666_v39 }
 0x128   : > { %v715_v49 = vmax.f32 %v673_v47, %v674_v43 }
 0x129   : > { %720 = vst.msk [vmem:[%s1047_s13 + $0x18] sm:$0xff] %vm716_vm0, %v711_v48 }
 0x12a   : > { %724 = vst.msk [vmem:[%s1047_s13 + $0x38] sm:$0xff] %vm716_vm0, %v715_v49 }
 0x12b PF: > { %s13_s12 = sadd.s32 1, %s944_s12  }
 0x12c   : > { %p10_p4 = scmp.ge.s32.totalorder %s13_s12, 4  }
 0x12e   :  { %12 = sbr.rel (!%p10_p4) target bundleno = 1 (0x1), region = 94 }

// kernel: model_forward.3
= control target key start
LH: loop header
LB: loop body
LE: loop exit
PB: predicated region body
PF: predicated region fallthrough
CT: control target
= control target key end

     0   :  { %v100_v30 = vlaneseq  ;;  %v540_v34 = vmov 1966171168   ;;  %s676_s0 = inlined_call_operand.vmem [shape: bf16[2,512], index: 0, kind: input, shape index: {}]   ;;  %s677_s1 = inlined_call_operand.vmem [shape: bf16[512,128], index: 1, kind: input, shape index: {}]   ;;  %s678_s2 = inlined_call_operand.vmem [shape: f32[1,128], index: 2, kind: input, shape index: {}]   ;;  %s679_s3 = inlined_call_operand.hbm [shape: f32[2,128], index: 3, kind: output, shape index: {}]  }
   0x1   :  { %v484_v0 = vld [vmem:[%s677_s1 + $0x40] sm:$0xff]   ;;  %v488_v4 = vld [vmem:[%s677_s1 + $0x48] sm:$0xff]   ;;  %v492_v8 = vld [vmem:[%s677_s1 + $0x50] sm:$0xff]   ;;  %v98_v35 = vunpack.c.l.s4 %v540_v34 }
   0x2   :  { %v485_v1 = vld [vmem:[%s677_s1 + $0xc0] sm:$0xff]   ;;  %438 = vmatprep.subr.bf16.mxu0 %v484_v0  ;;  %v489_v5 = vld [vmem:[%s677_s1 + $0xc8] sm:$0xff]   ;;  %v493_v9 = vld [vmem:[%s677_s1 + $0xd0] sm:$0xff]   ;;  %v101_v36 = vshrl.u32 %v100_v30, 7 }
   0x3   :  { %v486_v2 = vld [vmem:[%s677_s1] sm:$0xff]   ;;  %460 = vmatprep.subr.bf16.mxu1 %v485_v1  ;;  %v490_v6 = vld [vmem:[%s677_s1 + $0x8] sm:$0xff]   ;;  %v494_v10 = vld [vmem:[%s677_s1 + $0x10] sm:$0xff]  }
   0x4   :  { %v487_v3 = vld [vmem:[%s677_s1 + $0x80] sm:$0xff]   ;;  %439 = vmatpush3.bf16.msra.mxu0 %v486_v2  ;;  %v491_v7 = vld [vmem:[%s677_s1 + $0x88] sm:$0xff]   ;;  %v495_v11 = vld [vmem:[%s677_s1 + $0x90] sm:$0xff]  }
   0x5   :  { %461 = vmatpush3.bf16.msra.mxu1 %v487_v3  ;;  %440 = vmatprep.subr.bf16.mxu0 %v488_v4  ;;  %v496_v12 = vld [vmem:[%s677_s1 + $0x58] sm:$0xff]   ;;  %v500_v16 = vld [vmem:[%s677_s1 + $0x60] sm:$0xff]   ;;  %v504_v20 = vld [vmem:[%s677_s1 + $0x68] sm:$0xff]  }
   0x6   :  { %462 = vmatprep.subr.bf16.mxu1 %v489_v5  ;;  %v497_v13 = vld [vmem:[%s677_s1 + $0xd8] sm:$0xff]   ;;  %v501_v17 = vld [vmem:[%s677_s1 + $0xe0] sm:$0xff]   ;;  %v505_v21 = vld [vmem:[%s677_s1 + $0xe8] sm:$0xff]  }
   0x7   :  { %v498_v14 = vld [vmem:[%s677_s1 + $0x18] sm:$0xff]   ;;  %v502_v18 = vld [vmem:[%s677_s1 + $0x20] sm:$0xff]   ;;  %v506_v22 = vld [vmem:[%s677_s1 + $0x28] sm:$0xff]  }
   0x8   :  { %441 = vmatpush3.bf16.msra.mxu0 %v490_v6  ;;  %v499_v15 = vld [vmem:[%s677_s1 + $0x98] sm:$0xff]   ;;  %v503_v19 = vld [vmem:[%s677_s1 + $0xa0] sm:$0xff]   ;;  %v507_v23 = vld [vmem:[%s677_s1 + $0xa8] sm:$0xff]  }
   0x9   :  { %463 = vmatpush3.bf16.msra.mxu1 %v491_v7  ;;  %442 = vmatprep.subr.bf16.mxu0 %v492_v8  ;;  %v508_v24 = vld [vmem:[%s677_s1 + $0x70] sm:$0xff]   ;;  %v512_v28 = vld [vmem:[%s677_s1 + $0x78] sm:$0xff]   ;;  %v405_v33 = vld.sshfl [vmem:[%s676_s0] sm:$0x33 pattern:$0x75316420] }
   0xa   :  { %464 = vmatprep.subr.bf16.mxu1 %v493_v9  ;;  %v509_v25 = vld [vmem:[%s677_s1 + $0xf0] sm:$0xff]   ;;  %v513_v29 = vld [vmem:[%s677_s1 + $0xf8] sm:$0xff]  }
   0xb   :  { %v510_v26 = vld [vmem:[%s677_s1 + $0x30] sm:$0xff]   ;;  %v514_v31 = vld [vmem:[%s677_s1 + $0x38] sm:$0xff]  }
   0xc   :  { %443 = vmatpush3.bf16.msra.mxu0 %v494_v10  ;;  %v511_v27 = vld [vmem:[%s677_s1 + $0xb0] sm:$0xff]   ;;  %v515_v32 = vld [vmem:[%s677_s1 + $0xb8] sm:$0xff]  }
   0xd   :  { %465 = vmatpush3.bf16.msra.mxu1 %v495_v11  ;;  %444 = vmatprep.subr.bf16.mxu0 %v496_v12 }
   0xe   :  { %466 = vmatprep.subr.bf16.mxu1 %v497_v13 }
  0x10   :  { %445 = vmatpush3.bf16.msra.mxu0 %v498_v14 }
  0x11   :  { %467 = vmatpush3.bf16.msra.mxu1 %v499_v15  ;;  %446 = vmatprep.subr.bf16.mxu0 %v500_v16 }
  0x12   :  { %468 = vmatprep.subr.bf16.mxu1 %v501_v17 }
  0x14   :  { %447 = vmatpush3.bf16.msra.mxu0 %v502_v18 }
  0x15   :  { %469 = vmatpush3.bf16.msra.mxu1 %v503_v19  ;;  %448 = vmatprep.subr.bf16.mxu0 %v504_v20 }
  0x16   :  { %470 = vmatprep.subr.bf16.mxu1 %v505_v21 }
  0x18   :  { %449 = vmatpush3.bf16.msra.mxu0 %v506_v22 }
  0x19   :  { %471 = vmatpush3.bf16.msra.mxu1 %v507_v23  ;;  %450 = vmatprep.subr.bf16.mxu0 %v508_v24 }
  0x1a   :  { %472 = vmatprep.subr.bf16.mxu1 %v509_v25 }
  0x1c   :  { %451 = vmatpush3.bf16.msra.mxu0 %v510_v26 }
  0x1d   :  { %473 = vmatpush3.bf16.msra.mxu1 %v511_v27  ;;  %452 = vmatprep.subr.bf16.mxu0 %v512_v28 }
  0x1e   :  { %474 = vmatprep.subr.bf16.mxu1 %v513_v29 }
  0x20   :  { %453 = vmatpush3.bf16.msra.mxu0 %v514_v31 }
  0x21   :  { %475 = vmatpush3.bf16.msra.mxu1 %v515_v32 }
  0x22   :  { %8 = vsyncpa [#allocation3], 0  ;;  %v96_v37 = vcombine.high %v405_v33, %v405_v33  ;;  %v99_v38 = vunpack.c.0.s8 %v98_v35  ;;  %v404_v45 = vld [vmem:[%s678_s2] ss:$0 sm:$0xff]  ;;  %s541_s0 = smov [#allocation2]  }
  0x23   :  { %s396_s25 = sshll.u32 %s541_s0, 4  ;;  %s397_s25 = int_to_ptr.vmem [resolvable:$true] %s396_s25 }
  0x24   :  { %v102_v39 = vsub.s32 %v99_v38, %v101_v36  ;;  %s516_s26 = scalar_lea.vmem %s397_s25, 32  ;;  %p521_p1 = scmp.lt.s32.totalorder %s397_s25, %s397_s25 }
  0x25   :  { %p517_p0 = scmp.ne.s32.totalorder %s397_s25, %s516_s26  ;;  %p522_p2 = scmp.lt.s32.totalorder %s516_s26, %s516_s26 }
  0x26   :  { %v110_v40 = vrot.slane %v96_v37, %v102_v39  ;;  %v103_v41 = vrot.slane %v405_v33, %v102_v39 }
  0x27   :  { %p523_p3 = por %p522_p2, %p521_p1 }
  0x28   :  { %341 = vmatprep.mubr.bf16.mxu0 %v110_v40  ;;  %v112_v42 = vcombine.high %v110_v40, %v110_v40  ;;  %v111_v43 = vcombine.high %v103_v41, %v103_v41 }
  0x29   :  { %342 = vmatmul.mubr.bf16.vlgmr.msra.gmra.mrb[0].mxu0 %v103_v41  ;;  %p524_p4 = pnand %p523_p3, %p517_p0 }
  0x2a   :  { %381 = vmatprep.mubr.bf16.mxu1 %v112_v42 }
  0x2b   :  { %382 = vmatmul.mubr.bf16.vlgmr.msra.gmra.mrb[0].mxu1 %v111_v43 }
  0xfc   :  { %v454_v44 = vpop.f32.mrb[0].mxu0 }
  0xfd   :  { %v455_v46 = vpop.f32.mrb[1].mxu0 }
  0xfe   :  { %v476_v47 = vpop.f32.mrb[0].mxu1  ;;  %v456_v48 = vadd.f32 %v455_v46, %v454_v44  ;;  %v457_v49 = vpop.f32.mrb[2].mxu0 }
  0xff   :  { %v477_v50 = vpop.f32.mrb[1].mxu1  ;;  %v458_v51 = vpop.f32.mrb[3].mxu0 }
 0x100   :  { %v344_v52 = vadd.f32 %v456_v48, %v404_v45  ;;  %v478_v53 = vadd.f32 %v477_v50, %v476_v47  ;;  %v479_v54 = vpop.f32.mrb[2].mxu1 }
 0x101   :  { %v480_v55 = vpop.f32.mrb[3].mxu1 }
 0x102   :  { %v384_v56 = vadd.f32 %v478_v53, %v344_v52 }
 0x104   :  { %389 = vst [vmem:[#allocation2] sm:$0x3] %v384_v56 }
 0x105   :  { %527 = shalt.err (!%p524_p4)
}
 0x106   :  { %s528_s28 = scalar_lea.hbm %s679_s3, 32 }
 0x107   :  { %p529_p5 = scmp.ne.s32.totalorder %s679_s3, %s528_s28  ;;  %p532_p6 = scmp.lt.u32.totalorder %s528_s28, %s679_s3 }
 0x109   :  { %p534_p7 = pnand %p532_p6, %p529_p5 }
 0x10b   :  { %537 = shalt.err (!%p534_p7)
}
 0x10c   :  { %399 = dma.vmem_to_hbm [thread:$0]  %s397_s25, 32, %s679_s3, [#allocation3]  }
 0x10d   :  { %538 = dma.done.wait [#allocation3], 32  }
 0x10e   :  { %539 = vsyncadd [#allocation3], 4294967264 }
 0x10f   :  { %403 = vsyncpa [#allocation3], 1 }

</bundles_post_ra>
